<compile_context>
chip_gen: v7x
topology: tpu7x:2x2x1
jax: 0.10.0
libtpu: 0.0.40
codegen_flags: <defaults>
</compile_context>

<pallas_src>
import jax
import jax.numpy as jnp
from jax.experimental import pallas as pl
from jax.experimental.pallas import tpu as pltpu

_LANE = 128
_SUBLANE = 8


def _round_up(a: int, b: int) -> int:
    return ((a + b - 1) // b) * b


def _target_block_bytes() -> int:
    """Per-step input-block budget. Double-buffered, this stays well under the
    default scoped-VMEM limit on every generation (16 MiB v5e, 32 MiB v6e/v7x),
    while each step moves enough HBM bytes to hide the ~0.35 us step overhead."""
    try:
        kind = jax.devices()[0].device_kind.lower()
    except Exception:
        kind = ""
    if "v5 lite" in kind or "v5e" in kind:
        return 4 * 1024 * 1024  # smallest scoped-VMEM default / lowest HBM BW
    return 6 * 1024 * 1024      # v6e / v7x (<= reviewer's ~6-8 MiB v7x cap)


def _make_kernel(hw: int, chunk: int, needs_mask: bool, inv_hw: float):
    def kernel(x_ref, o_ref, acc_ref):
        k = pl.program_id(1)

        @pl.when(k == 0)
        def _init():
            acc_ref[...] = jnp.zeros_like(acc_ref)

        x = x_ref[...].astype(jnp.float32)  # (row_tile, chunk)
        if needs_mask:
            # Last hw-chunk may extend past H*W: zero the invalid tail columns
            # so they don't contaminate the row sums.
            col = jax.lax.broadcasted_iota(jnp.int32, x.shape, 1)
            valid = hw - k * chunk
            x = jnp.where(col < valid, x, 0.0)

        acc_ref[...] += jnp.sum(x, axis=-1, keepdims=True)

        @pl.when(k == pl.num_programs(1) - 1)
        def _finalize():
            o_ref[...] = (acc_ref[...] * inv_hw).astype(o_ref.dtype)

    return kernel


def global_avg_pool_2d(x: jax.Array) -> jax.Array:
    """Exact equivalent of GlobalAvgPool2d.forward: (N, C, H, W) -> (N, C)."""
    n, c, h, w = x.shape
    rows = n * c
    hw = h * w
    x2 = x.reshape(rows, hw)
    itemsize = jnp.dtype(x.dtype).itemsize

    # Row tile: multiple of 8, capped at 256, and chosen so the 'parallel' row
    # axis has >= 2 steps whenever rows allows it (megacore / 2 TCs on v7x).
    row_tile = min(256, max(_SUBLANE, _round_up(pl.cdiv(rows, 2), _SUBLANE)))
    num_row_tiles = pl.cdiv(rows, row_tile)

    # H*W chunk: stream the reduction axis in lane-aligned blocks sized against
    # the VMEM budget (this op is purely HBM-bandwidth bound).
    chunk = _target_block_bytes() // (row_tile * itemsize)
    chunk = max(_LANE, (chunk // _LANE) * _LANE)
    if hw <= chunk:
        chunk = hw            # single reduction step; full-row block
        needs_mask = False
    else:
        needs_mask = (hw % chunk) != 0
    num_k = pl.cdiv(hw, chunk)

    kernel = _make_kernel(hw, chunk, needs_mask, 1.0 / float(hw))

    out = pl.pallas_call(
        kernel,
        out_shape=jax.ShapeDtypeStruct((rows, 1), x.dtype),
        grid_spec=pltpu.PrefetchScalarGridSpec(
            num_scalar_prefetch=0,
            grid=(num_row_tiles, num_k),            # reduction axis last
            in_specs=[pl.BlockSpec((row_tile, chunk), lambda i, k: (i, k))],
            out_specs=pl.BlockSpec((row_tile, 1), lambda i, k: (i, 0)),
            scratch_shapes=[pltpu.VMEM((row_tile, 1), jnp.float32)],
        ),
        compiler_params=pltpu.CompilerParams(
            dimension_semantics=("parallel", "arbitrary"),
        ),
        cost_estimate=pl.CostEstimate(
            flops=rows * hw,
            transcendentals=0,
            bytes_accessed=rows * hw * itemsize + rows * itemsize,
        ),
    )(x2)

    # TODO(synk): output is a (rows, 1) column (tiny, written once per row tile);
    # a lane-dense (1, row_tile) store would need a sublane->lane relayout.
    return out.reshape(n, c)


if __name__ == "__main__":
    key = jax.random.PRNGKey(0)
    x = jax.random.normal(key, (2, 4, 16, 16), dtype=jnp.float32)

    y = global_avg_pool_2d(x)
    jax.block_until_ready(y)

    # Reference check against plain JAX (same semantics as the torch module).
    y_ref = x.reshape(2, 4, -1).mean(axis=2)
    assert y.shape == (2, 4)
    assert jnp.allclose(y, y_ref, atol=1e-6, rtol=1e-6)

    print("KERNEL_OK")
</pallas_src>

<mosaic_0001>
module attributes {stable_mosaic.version = 11 : i64} {
  func.func @kernel(%arg0: i32, %arg1: i32, %arg2: memref<8x256xf32, #tpu.memory_space<vmem>>, %arg3: memref<8x1xf32, #tpu.memory_space<vmem>>, %arg4: memref<8x1xf32, #tpu.memory_space<vmem>>) attributes {dimension_semantics = [#tpu.dimension_semantics<parallel>, #tpu.dimension_semantics<arbitrary>], iteration_bounds = array<i64: 1, 1>, scalar_prefetch = 0 : i64, scratch_operands = 1 : i64, tpu.core_type = #tpu.core_type<tc>, window_params = [{transform_indices = @transform_0, window_bounds = array<i64: 8, 256>}, {transform_indices = @transform_1, window_bounds = array<i64: 8, 1>}]} {
    %c0_i32 = arith.constant 0 : i32
    %0 = arith.cmpi eq, %arg1, %c0_i32 : i32
    %1 = arith.extui %0 : i1 to i32
    %c0_i32_0 = arith.constant 0 : i32
    %2 = arith.cmpi ne, %1, %c0_i32_0 : i32
    scf.if %2 {
      %cst_8 = arith.constant 0.000000e+00 : f32
      %12 = vector.broadcast %cst_8 : f32 to vector<8x1xf32>
      %c0_9 = arith.constant 0 : index
      %c0_10 = arith.constant 0 : index
      %13 = vector.load %arg4[%c0_9, %c0_10] : memref<8x1xf32, #tpu.memory_space<vmem>>, vector<8x1xf32>
      tpu.vector_store %arg4[%c0_9, %c0_10], %12 {strides = array<i32>} : memref<8x1xf32, #tpu.memory_space<vmem>>, vector<8x1xf32>,
    } else {
    }
    %c0 = arith.constant 0 : index
    %c0_1 = arith.constant 0 : index
    %3 = vector.load %arg2[%c0, %c0_1] : memref<8x256xf32, #tpu.memory_space<vmem>>, vector<8x256xf32>
    %c0_2 = arith.constant 0 : index
    %c0_3 = arith.constant 0 : index
    %4 = vector.load %arg4[%c0_2, %c0_3] : memref<8x1xf32, #tpu.memory_space<vmem>>, vector<8x1xf32>
    %cst = arith.constant dense<0.000000e+00> : vector<8xf32>
    %5 = vector.multi_reduction <add>, %3, %cst [1] : vector<8x256xf32> to vector<8xf32>
    %6 = vector.shape_cast %5 : vector<8xf32> to vector<8x1xf32>
    %7 = arith.addf %4, %6 : vector<8x1xf32>
    %c0_4 = arith.constant 0 : index
    %c0_5 = arith.constant 0 : index
    %8 = vector.load %arg4[%c0_4, %c0_5] : memref<8x1xf32, #tpu.memory_space<vmem>>, vector<8x1xf32>
    tpu.vector_store %arg4[%c0_4, %c0_5], %7 {strides = array<i32>} : memref<8x1xf32, #tpu.memory_space<vmem>>, vector<8x1xf32>,
    %c0_i32_6 = arith.constant 0 : i32
    %9 = arith.cmpi eq, %arg1, %c0_i32_6 : i32
    %10 = arith.extui %9 : i1 to i32
    %c0_i32_7 = arith.constant 0 : i32
    %11 = arith.cmpi ne, %10, %c0_i32_7 : i32
    scf.if %11 {
      %c0_8 = arith.constant 0 : index
      %c0_9 = arith.constant 0 : index
      %12 = vector.load %arg4[%c0_8, %c0_9] : memref<8x1xf32, #tpu.memory_space<vmem>>, vector<8x1xf32>
      %cst_10 = arith.constant 3.906250e-03 : f32
      %13 = vector.broadcast %cst_10 : f32 to vector<8x1xf32>
      %14 = arith.mulf %12, %13 : vector<8x1xf32>
      %c0_11 = arith.constant 0 : index
      %c0_12 = arith.constant 0 : index
      %15 = vector.load %arg3[%c0_11, %c0_12] : memref<8x1xf32, #tpu.memory_space<vmem>>, vector<8x1xf32>
      tpu.vector_store %arg3[%c0_11, %c0_12], %14 {strides = array<i32>} : memref<8x1xf32, #tpu.memory_space<vmem>>, vector<8x1xf32>,
    } else {
    }
    return
  }
  func.func @transform_0(%arg0: i32, %arg1: i32) -> (i32, i32) {
    %c0_i32 = arith.constant 0 : i32
    return %arg0, %arg1 : i32, i32
  }
  func.func @transform_1(%arg0: i32, %arg1: i32) -> (i32, i32) {
    %c0_i32 = arith.constant 0 : i32
    %c0_i32_0 = arith.constant 0 : i32
    return %arg0, %c0_i32 : i32, i32
  }
}

</mosaic_0001>

<bundles_post_ra>
// kernel: tpu_custom_call.1
= control target key start
LH: loop header
LB: loop body
LE: loop exit
PB: predicated region body
PF: predicated region fallthrough
CT: control target
= control target key end

     0   :  { %6 = vsyncpa [#allocation4], 0  ;;  %s72_s6 = smov [#allocation3]   ;;  %s99_s0 = inlined_call_operand.hbm [shape: f32[8,256], index: 0, kind: input, shape index: {}]   ;;  %s100_s1 = inlined_call_operand.vmem [shape: f32[8,1], index: 1, kind: output, shape index: {}]  }
   0x1   :  { %s13_s7 = sshll.u32 %s72_s6, 4  ;;  %s48_s10 = scalar_lea.hbm %s99_s0, 256  ;;  %s14_s7 = int_to_ptr.vmem [resolvable:$true] %s13_s7 }
   0x2   :  { %p49_p0 = scmp.ne.s32.totalorder %s99_s0, %s48_s10  ;;  %p52_p1 = scmp.lt.u32.totalorder %s48_s10, %s99_s0 }
   0x4   :  { %p54_p2 = pnand %p52_p1, %p49_p0 }
   0x6   :  { %57 = shalt.err (!%p54_p2)
}
   0x7   :  { %s58_s15 = scalar_lea.vmem %s14_s7, 256  ;;  %p63_p4 = scmp.lt.s32.totalorder %s14_s7, %s14_s7 }
   0x8   :  { %p59_p3 = scmp.ne.s32.totalorder %s14_s7, %s58_s15  ;;  %p64_p5 = scmp.lt.s32.totalorder %s58_s15, %s58_s15 }
   0xa   :  { %p65_p6 = por %p64_p5, %p63_p4 }
   0xc   :  { %p66_p7 = pnand %p65_p6, %p59_p3 }
   0xe   :  { %69 = shalt.err (!%p66_p7)
}
   0xf   :  { %16 = dma.hbm_to_vmem [thread:$0]  %s99_s0, 256, %s14_s7, [#allocation4]  }
  0x10   :  { %70 = dma.done.wait [#allocation4], 256  }
  0x11   :  { %71 = vsyncadd [#allocation4], 4294967040  ;;  %vm24_vm0 = vcmask 7168   ;;  %v73_v0 = vmov 0.0   ;;  %v26_v1 = vld [vmem:[#allocation3] sm:$0xff]  ;;  %v27_v2 = vld [vmem:[#allocation3 + $0x8] sm:$0xff] }
  0x12   :  { %25 = vst.msk [vmem:[#allocation2] sm:$0xff] %vm24_vm0, %v73_v0  ;;  %v29_v3 = vadd.f32 %v27_v2, %v26_v1 }
  0x14   :  { %30 = vadd.xlane.f32.xlu0 %v29_v3 }
  0x19   :  { %v28_v4 = vld [vmem:[#allocation2] sm:$0xff] }
  0xa1   :  { %v31_v5 = vpop.xlane.xlu0 %30 }
  0xa2   :  { %v32_v6 = vadd.f32 %v31_v5, %v28_v4 }
  0xa4   :  { %34 = vst.msk [vmem:[#allocation2] sm:$0xff] %vm24_vm0, %v32_v6 }
  0xab   :  { %v38_v7 = vld [vmem:[#allocation2] sm:$0xff] }
  0xac   :  { %v39_v8 = vmul.f32 0.00390625, %v38_v7 }
  0xae   :  { %40 = vst.msk [vmem:[%s100_s1] sm:$0xff] %vm24_vm0, %v39_v8 }
  0xaf   :  { %45 = vsyncpa [#allocation4], 1 }

</bundles_post_ra>
